<compile_context>
chip_gen: v7x
topology: tpu7x:2x2x1
jax: 0.10.0
libtpu: 0.0.40
codegen_flags: <defaults>
</compile_context>

<pallas_src>
import functools

import jax
import jax.numpy as jnp
from jax.experimental import pallas as pl
from jax.experimental.pallas import tpu as pltpu


def _round_up(x: int, m: int) -> int:
    return ((x + m - 1) // m) * m


def kliep_kernel(w_ref, phi_nu_ref, phi_de_ref, out_log_ref, out_de_ref,
                 acc_log_ref, col_sum_ref, *,
                 n_nu, n_de, tile_rows, nu0, nu1, de0, de1):
    """One (core, sample-tile) step of the streaming negative-KLIEP reduction."""
    c = pl.program_id(0)                      # TensorCore shard  ("parallel")
    j = pl.program_id(1)                      # sample-tile step  ("arbitrary")

    @pl.when(j == 0)
    def _init():
        acc_log_ref[...] = jnp.zeros_like(acc_log_ref)
        col_sum_ref[...] = jnp.zeros_like(col_sum_ref)

    # Per-core tile counts of the two (decoupled) streams.
    nu_count = jnp.where(c == 0, nu0, nu1)
    de_count = jnp.where(c == 0, de0, de1)

    # ---- numerator: r_nu = w . Phi_nu^T on the MXU -> lane-dense [1, T] ----
    @pl.when(j < nu_count)
    def _nu():
        w8 = w_ref[...]                                      # [8, B] (rows identical)
        r8 = jax.lax.dot_general(
            w8, phi_nu_ref[...],
            dimension_numbers=(((1,), (1,)), ((), ())),
            preferred_element_type=jnp.float32)              # [8, T]
        r_nu = r8[0:1, :]                                    # [1, T] lane-dense
        tile_idx = c * nu0 + j
        row_ids = tile_idx * tile_rows + jax.lax.broadcasted_iota(
            jnp.int32, (1, tile_rows), 1)
        valid = row_ids < n_nu                               # mask block overhang
        # NOTE: log assumes r_nu > 0 for valid rows (positive RBF features x
        # positive weights; same assumption as the PyTorch reference).
        acc_log_ref[...] += jnp.log(jnp.where(valid, r_nu, 1.0))

    # ---- denominator: streaming masked column-sum of Phi_de ----
    @pl.when(j < de_count)
    def _de():
        tile_idx = c * de0 + j
        row_ids = tile_idx * tile_rows + jax.lax.broadcasted_iota(
            jnp.int32, (tile_rows, 1), 0)
        valid = row_ids < n_de                               # mask block overhang
        col_sum_ref[...] += jnp.sum(
            jnp.where(valid, phi_de_ref[...], 0.0), axis=0, keepdims=True)

    # ---- per-core partial results; combined in the wrapper epilogue ----
    @pl.when(j == pl.num_programs(1) - 1)
    def _finalize():
        out_log_ref[...] = jnp.sum(acc_log_ref[...], axis=1, keepdims=True)
        out_de_ref[...] = jnp.sum(col_sum_ref[...] * w_ref[0:1, :],
                                  axis=1, keepdims=True)


def neg_kliep_loss(weights, phi_nu, phi_de, *, tile_rows=None):
    """Pallas wrapper: returns the scalar negative-KLIEP objective."""
    weights = jnp.asarray(weights, jnp.float32).reshape(-1)
    phi_nu = jnp.asarray(phi_nu, jnp.float32)
    phi_de = jnp.asarray(phi_de, jnp.float32)

    n_nu, b = phi_nu.shape
    n_de, b2 = phi_de.shape
    assert b == b2 == weights.shape[0]
    assert n_nu >= 1 and n_de >= 1

    # ---- tile sizing / VMEM budget derived from the actual chip ----
    lanes = _round_up(b, 128)               # VMEM lane footprint of one row
    try:
        vmem_cap = int(getattr(pltpu.get_tpu_info(), "vmem_capacity_bytes",
                               64 * 1024 * 1024))
    except Exception:                       # conservative (v7x per-TC) fallback
        vmem_cap = 64 * 1024 * 1024
    budget = int(0.6 * vmem_cap)            # headroom for compiler scratch

    if tile_rows is None:
        # ~4 MiB of fresh HBM bytes per grid step (both matrices together) so
        # the ~0.35 us per-step overhead stays negligible even at v7x BW.
        t = (4 * 1024 * 1024) // max(2 * b * 4, 1)
        t = max(t, 1024)
    else:
        t = int(tile_rows)
    # Working set: 2 inputs x 2 pipeline buffers x tile + w + scratch.
    per_row_vmem = 4 * lanes * 4 + 32
    fixed_vmem = (2 * 8 + 8 + 8) * lanes * 4 + (1 << 20)
    t = min(t, max(8, (budget - fixed_vmem) // per_row_vmem))
    t = min(t, _round_up(max(n_nu, n_de), 8))
    t = max(8, (t // 8) * 8)

    # ---- decoupled tile counts, split across the 2 TensorCores ----
    nt_nu = pl.cdiv(n_nu, t)
    nt_de = pl.cdiv(n_de, t)
    nu0 = -(-nt_nu // 2)
    nu1 = nt_nu - nu0
    de0 = -(-nt_de // 2)
    de1 = nt_de - de0
    n_inner = max(nu0, de0)

    # Tiny host-side replicate keeps the MXU lhs on the >=8-sublane path.
    w2d = jnp.broadcast_to(weights, (8, b))

    def nu_map(c, j):
        last = jnp.where(c == 0, nu0 - 1, nt_nu - 1)
        return (jnp.minimum(c * nu0 + j, last), 0)

    def de_map(c, j):
        last = jnp.where(c == 0, de0 - 1, nt_de - 1)
        return (jnp.minimum(c * de0 + j, last), 0)

    working = (4 * t * lanes * 4 + 2 * 8 * lanes * 4
               + 8 * _round_up(t, 128) * 4 + 8 * lanes * 4)
    vmem_limit = int(min(budget, max(2 * working, 8 * 1024 * 1024)))

    kernel = functools.partial(
        kliep_kernel, n_nu=n_nu, n_de=n_de, tile_rows=t,
        nu0=nu0, nu1=nu1, de0=de0, de1=de1)

    partial_log, partial_de = pl.pallas_call(
        kernel,
        out_shape=(jax.ShapeDtypeStruct((2, 1, 1), jnp.float32),
                   jax.ShapeDtypeStruct((2, 1, 1), jnp.float32)),
        grid_spec=pltpu.PrefetchScalarGridSpec(
            num_scalar_prefetch=0,
            grid=(2, n_inner),
            in_specs=[
                pl.BlockSpec((8, b), lambda c, j: (0, 0)),   # weights (resident)
                pl.BlockSpec((t, b), nu_map),                # Phi_nu tile
                pl.BlockSpec((t, b), de_map),                # Phi_de tile
            ],
            out_specs=[
                pl.BlockSpec((None, 1, 1), lambda c, j: (c, 0, 0)),  # per-core sum log(r_nu)
                pl.BlockSpec((None, 1, 1), lambda c, j: (c, 0, 0)),  # per-core sum r_de
            ],
            scratch_shapes=[
                pltpu.VMEM((1, t), jnp.float32),   # lane-dense running log-sum
                pltpu.VMEM((1, b), jnp.float32),   # running colsum(Phi_de)
            ],
        ),
        compiler_params=pltpu.CompilerParams(
            dimension_semantics=("parallel", "arbitrary"),
            vmem_limit_bytes=vmem_limit,
        ),
    )(w2d, phi_nu, phi_de)

    # Trivial cross-core combine epilogue.
    log_sum = jnp.sum(partial_log)
    de_sum = jnp.sum(partial_de)
    return -log_sum / jnp.float32(n_nu) + jnp.log(de_sum / jnp.float32(n_de))


def _reference(weights, phi_nu, phi_de):
    # Pure-VPU f32 reference (no MXU precision ambiguity).
    r_nu = jnp.sum(phi_nu * weights[None, :], axis=1)
    r_de = jnp.sum(phi_de * weights[None, :], axis=1)
    return -jnp.mean(jnp.log(r_nu)) + jnp.log(jnp.mean(r_de))


def _rbf_design(x, centers, sigma):
    # Gaussian RBF kernel matrix: [n_samples, n_centers], strictly positive.
    d2 = jnp.sum((x[:, None, :] - centers[None, :, :]) ** 2, axis=-1)
    return jnp.exp(-d2 / (2.0 * sigma ** 2))


if __name__ == "__main__":
    key = jax.random.PRNGKey(0)
    k1, k2, k3, k4 = jax.random.split(key, 4)

    # Non-multiple-of-8 sample counts and non-multiple-of-128 basis count so
    # the unpadded / overhang-masked path is exercised end to end.
    n_nu, n_de, n_basis, dim = 18, 27, 40, 4
    sigma = 1.0

    x_nu = jax.random.normal(k1, (n_nu, dim), jnp.float32)          # numerator samples
    x_de = jax.random.normal(k2, (n_de, dim), jnp.float32) + 0.5    # denominator samples
    centers = jax.random.normal(k3, (n_basis, dim), jnp.float32)    # kernel centers

    phi_nu = _rbf_design(x_nu, centers, sigma)   # [18, 40]
    phi_de = _rbf_design(x_de, centers, sigma)   # [27, 40]

    # Deterministic, strictly-positive initial weights (the nn.Parameter).
    weights = jax.random.uniform(k4, (n_basis,), jnp.float32, 0.5, 1.5)

    ref = _reference(weights, phi_nu, phi_de)

    # tile_rows=8: multi-step accumulator, decoupled nu/de tile counts,
    # two-core split and row-overhang masking all get exercised.
    loss = jax.block_until_ready(
        neg_kliep_loss(weights, phi_nu, phi_de, tile_rows=8))
    assert jnp.isfinite(loss), "non-finite loss"
    assert jnp.allclose(loss, ref, rtol=1e-4, atol=1e-5), (loss, ref)

    # Auto-sized tiles (the production path: single big tile here).
    loss2 = jax.block_until_ready(neg_kliep_loss(weights, phi_nu, phi_de))
    assert jnp.isfinite(loss2), "non-finite loss"
    assert jnp.allclose(loss2, ref, rtol=1e-4, atol=1e-5), (loss2, ref)

    print("KERNEL_OK")
</pallas_src>

<mosaic_0001>
module attributes {stable_mosaic.version = 11 : i64} {
  func.func @kliep_kernel(%arg0: i32, %arg1: i32, %arg2: memref<8x40xf32, #tpu.memory_space<vmem>>, %arg3: memref<8x40xf32, #tpu.memory_space<vmem>>, %arg4: memref<8x40xf32, #tpu.memory_space<vmem>>, %arg5: memref<1x1x1xf32, #tpu.memory_space<vmem>>, %arg6: memref<1x1x1xf32, #tpu.memory_space<vmem>>, %arg7: memref<1x8xf32, #tpu.memory_space<vmem>>, %arg8: memref<1x40xf32, #tpu.memory_space<vmem>>) attributes {dimension_semantics = [#tpu.dimension_semantics<parallel>, #tpu.dimension_semantics<arbitrary>], iteration_bounds = array<i64: 2, 2>, scalar_prefetch = 0 : i64, scratch_operands = 2 : i64, tpu.core_type = #tpu.core_type<tc>, window_params = [{pipeline_mode = #tpu.pipeline_mode<synchronous>, transform_indices = @transform_0, window_bounds = array<i64: 8, 40>}, {transform_indices = @transform_1, window_bounds = array<i64: 8, 40>}, {transform_indices = @transform_2, window_bounds = array<i64: 8, 40>}, {transform_indices = @transform_3, window_bounds = array<i64: 1, 1, 1>}, {transform_indices = @transform_4, window_bounds = array<i64: 1, 1, 1>}]} {
    %c0_i32 = arith.constant 0 : i32
    %0 = arith.cmpi eq, %arg1, %c0_i32 : i32
    %1 = arith.extui %0 : i1 to i32
    %c0_i32_0 = arith.constant 0 : i32
    %2 = arith.cmpi ne, %1, %c0_i32_0 : i32
    scf.if %2 {
      %cst = arith.constant 0.000000e+00 : f32
      %16 = vector.broadcast %cst : f32 to vector<1x8xf32>
      %c0 = arith.constant 0 : index
      %c0_9 = arith.constant 0 : index
      %17 = vector.load %arg7[%c0, %c0_9] : memref<1x8xf32, #tpu.memory_space<vmem>>, vector<1x8xf32>
      tpu.vector_store %arg7[%c0, %c0_9], %16 {strides = array<i32>} : memref<1x8xf32, #tpu.memory_space<vmem>>, vector<1x8xf32>,
      %cst_10 = arith.constant 0.000000e+00 : f32
      %18 = vector.broadcast %cst_10 : f32 to vector<1x40xf32>
      %c0_11 = arith.constant 0 : index
      %c0_12 = arith.constant 0 : index
      %19 = vector.load %arg8[%c0_11, %c0_12] : memref<1x40xf32, #tpu.memory_space<vmem>>, vector<1x40xf32>
      tpu.vector_store %arg8[%c0_11, %c0_12], %18 {strides = array<i32>} : memref<1x40xf32, #tpu.memory_space<vmem>>, vector<1x40xf32>,
    } else {
    }
    %c0_i32_1 = arith.constant 0 : i32
    %3 = arith.cmpi eq, %arg0, %c0_i32_1 : i32
    %c2_i32 = arith.constant 2 : i32
    %c1_i32 = arith.constant 1 : i32
    %4 = arith.select %3, %c2_i32, %c1_i32 : i32
    %c0_i32_2 = arith.constant 0 : i32
    %5 = arith.cmpi eq, %arg0, %c0_i32_2 : i32
    %c2_i32_3 = arith.constant 2 : i32
    %c2_i32_4 = arith.constant 2 : i32
    %6 = arith.select %5, %c2_i32_3, %c2_i32_4 : i32
    %7 = arith.cmpi slt, %arg1, %4 : i32
    %8 = arith.extui %7 : i1 to i32
    %c0_i32_5 = arith.constant 0 : i32
    %9 = arith.cmpi ne, %8, %c0_i32_5 : i32
    scf.if %9 {
      %c0 = arith.constant 0 : index
      %c0_9 = arith.constant 0 : index
      %16 = vector.load %arg2[%c0, %c0_9] : memref<8x40xf32, #tpu.memory_space<vmem>>, vector<8x40xf32>
      %c0_10 = arith.constant 0 : index
      %c0_11 = arith.constant 0 : index
      %17 = vector.load %arg3[%c0_10, %c0_11] : memref<8x40xf32, #tpu.memory_space<vmem>>, vector<8x40xf32>
      %cst = arith.constant dense<0.000000e+00> : vector<8x8xf32>
      %18 = tpu.matmul %16, %17, %cst {dimension_numbers = #tpu.dot_dimension_numbers<[1], [1], [0], [0], [0, 0, 1, 0], [], []>} : vector<8x40xf32>, vector<8x40xf32>, vector<8x8xf32> -> vector<8x8xf32>
      %19 = vector.extract_strided_slice %18 {offsets = [0, 0], sizes = [1, 8], strides = [1, 1]} : vector<8x8xf32> to vector<1x8xf32>
      %c2_i32_12 = arith.constant 2 : i32
      %20 = arith.muli %arg0, %c2_i32_12 : i32
      %21 = arith.addi %20, %arg1 : i32
      %c8_i32 = arith.constant 8 : i32
      %22 = arith.muli %21, %c8_i32 : i32
      %23 = tpu.iota {dimensions = array<i32: 1>} : vector<1x8xi32>
      %24 = vector.broadcast %22 : i32 to vector<1x8xi32>
      %25 = arith.addi %24, %23 : vector<1x8xi32>
      %c18_i32 = arith.constant 18 : i32
      %26 = vector.broadcast %c18_i32 : i32 to vector<1x8xi32>
      %27 = arith.cmpi slt, %25, %26 : vector<1x8xi32>
      %c0_13 = arith.constant 0 : index
      %c0_14 = arith.constant 0 : index
      %28 = vector.load %arg7[%c0_13, %c0_14] : memref<1x8xf32, #tpu.memory_space<vmem>>, vector<1x8xf32>
      %cst_15 = arith.constant 1.000000e+00 : f32
      %29 = vector.broadcast %cst_15 : f32 to vector<1x8xf32>
      %30 = arith.select %27, %19, %29 : vector<1x8xi1>, vector<1x8xf32>
      %31 = math.log %30 : vector<1x8xf32>
      %32 = arith.addf %28, %31 : vector<1x8xf32>
      %c0_16 = arith.constant 0 : index
      %c0_17 = arith.constant 0 : index
      %33 = vector.load %arg7[%c0_16, %c0_17] : memref<1x8xf32, #tpu.memory_space<vmem>>, vector<1x8xf32>
      tpu.vector_store %arg7[%c0_16, %c0_17], %32 {strides = array<i32>} : memref<1x8xf32, #tpu.memory_space<vmem>>, vector<1x8xf32>,
    } else {
    }
    %10 = arith.cmpi slt, %arg1, %6 : i32
    %11 = arith.extui %10 : i1 to i32
    %c0_i32_6 = arith.constant 0 : i32
    %12 = arith.cmpi ne, %11, %c0_i32_6 : i32
    scf.if %12 {
      %c2_i32_9 = arith.constant 2 : i32
      %16 = arith.muli %arg0, %c2_i32_9 : i32
      %17 = arith.addi %16, %arg1 : i32
      %c8_i32 = arith.constant 8 : i32
      %18 = arith.muli %17, %c8_i32 : i32
      %19 = tpu.iota {dimensions = array<i32: 0>} : vector<8x1xi32>
      %20 = vector.broadcast %18 : i32 to vector<8x1xi32>
      %21 = arith.addi %20, %19 : vector<8x1xi32>
      %c27_i32 = arith.constant 27 : i32
      %22 = vector.broadcast %c27_i32 : i32 to vector<8x1xi32>
      %23 = arith.cmpi slt, %21, %22 : vector<8x1xi32>
      %c0 = arith.constant 0 : index
      %c0_10 = arith.constant 0 : index
      %24 = vector.load %arg8[%c0, %c0_10] : memref<1x40xf32, #tpu.memory_space<vmem>>, vector<1x40xf32>
      %c0_11 = arith.constant 0 : index
      %c0_12 = arith.constant 0 : index
      %25 = vector.load %arg4[%c0_11, %c0_12] : memref<8x40xf32, #tpu.memory_space<vmem>>, vector<8x40xf32>
      %cst = arith.constant 0.000000e+00 : f32
      %26 = vector.shape_cast %23 : vector<8x1xi1> to vector<8x1xi1>
      %27 = vector.broadcast %26 : vector<8x1xi1> to vector<8x40xi1>
      %28 = vector.broadcast %cst : f32 to vector<8x40xf32>
      %29 = arith.select %27, %25, %28 : vector<8x40xi1>, vector<8x40xf32>
      %cst_13 = arith.constant dense<0.000000e+00> : vector<40xf32>
      %30 = vector.multi_reduction <add>, %29, %cst_13 [0] : vector<8x40xf32> to vector<40xf32>
      %31 = vector.shape_cast %30 : vector<40xf32> to vector<1x40xf32>
      %32 = arith.addf %24, %31 : vector<1x40xf32>
      %c0_14 = arith.constant 0 : index
      %c0_15 = arith.constant 0 : index
      %33 = vector.load %arg8[%c0_14, %c0_15] : memref<1x40xf32, #tpu.memory_space<vmem>>, vector<1x40xf32>
      tpu.vector_store %arg8[%c0_14, %c0_15], %32 {strides = array<i32>} : memref<1x40xf32, #tpu.memory_space<vmem>>, vector<1x40xf32>,
    } else {
    }
    %c1_i32_7 = arith.constant 1 : i32
    %13 = arith.cmpi eq, %arg1, %c1_i32_7 : i32
    %14 = arith.extui %13 : i1 to i32
    %c0_i32_8 = arith.constant 0 : i32
    %15 = arith.cmpi ne, %14, %c0_i32_8 : i32
    scf.if %15 {
      %c0 = arith.constant 0 : index
      %c0_9 = arith.constant 0 : index
      %16 = vector.load %arg7[%c0, %c0_9] : memref<1x8xf32, #tpu.memory_space<vmem>>, vector<1x8xf32>
      %cst = arith.constant dense<0.000000e+00> : vector<1xf32>
      %17 = vector.multi_reduction <add>, %16, %cst [1] : vector<1x8xf32> to vector<1xf32>
      %18 = vector.shape_cast %17 : vector<1xf32> to vector<1x1xf32>
      %c0_10 = arith.constant 0 : index
      %c0_11 = arith.constant 0 : index
      %c0_12 = arith.constant 0 : index
      %19 = vector.load %arg5[%c0_10, %c0_11, %c0_12] : memref<1x1x1xf32, #tpu.memory_space<vmem>>, vector<1x1x1xf32>
      %20 = vector.shape_cast %19 : vector<1x1x1xf32> to vector<1x1xf32>
      %21 = vector.shape_cast %18 : vector<1x1xf32> to vector<1x1x1xf32>
      tpu.vector_store %arg5[%c0_10, %c0_11, %c0_12], %21 {strides = array<i32>} : memref<1x1x1xf32, #tpu.memory_space<vmem>>, vector<1x1x1xf32>,
      %c0_13 = arith.constant 0 : index
      %c0_14 = arith.constant 0 : index
      %22 = vector.load %arg8[%c0_13, %c0_14] : memref<1x40xf32, #tpu.memory_space<vmem>>, vector<1x40xf32>
      %c0_15 = arith.constant 0 : index
      %c0_16 = arith.constant 0 : index
      %23 = vector.load %arg2[%c0_15, %c0_16] : memref<8x40xf32, #tpu.memory_space<vmem>>, vector<1x40xf32>
      %24 = arith.mulf %22, %23 : vector<1x40xf32>
      %cst_17 = arith.constant dense<0.000000e+00> : vector<1xf32>
      %25 = vector.multi_reduction <add>, %24, %cst_17 [1] : vector<1x40xf32> to vector<1xf32>
      %26 = vector.shape_cast %25 : vector<1xf32> to vector<1x1xf32>
      %c0_18 = arith.constant 0 : index
      %c0_19 = arith.constant 0 : index
      %c0_20 = arith.constant 0 : index
      %27 = vector.load %arg6[%c0_18, %c0_19, %c0_20] : memref<1x1x1xf32, #tpu.memory_space<vmem>>, vector<1x1x1xf32>
      %28 = vector.shape_cast %27 : vector<1x1x1xf32> to vector<1x1xf32>
      %29 = vector.shape_cast %26 : vector<1x1xf32> to vector<1x1x1xf32>
      tpu.vector_store %arg6[%c0_18, %c0_19, %c0_20], %29 {strides = array<i32>} : memref<1x1x1xf32, #tpu.memory_space<vmem>>, vector<1x1x1xf32>,
    } else {
    }
    return
  }
  func.func @transform_0(%arg0: i32, %arg1: i32) -> (i32, i32) {
    %c0_i32 = arith.constant 0 : i32
    %c0_i32_0 = arith.constant 0 : i32
    %c0_i32_1 = arith.constant 0 : i32
    return %c0_i32, %c0_i32_0 : i32, i32
  }
  func.func @transform_1(%arg0: i32, %arg1: i32) -> (i32, i32) {
    %c0_i32 = arith.constant 0 : i32
    %0 = arith.cmpi eq, %arg0, %c0_i32 : i32
    %c1_i32 = arith.constant 1 : i32
    %c2_i32 = arith.constant 2 : i32
    %1 = arith.select %0, %c1_i32, %c2_i32 : i32
    %c2_i32_0 = arith.constant 2 : i32
    %2 = arith.muli %arg0, %c2_i32_0 : i32
    %3 = arith.addi %2, %arg1 : i32
    %4 = arith.minsi %3, %1 : i32
    %c0_i32_1 = arith.constant 0 : i32
    %c0_i32_2 = arith.constant 0 : i32
    return %4, %c0_i32_1 : i32, i32
  }
  func.func @transform_2(%arg0: i32, %arg1: i32) -> (i32, i32) {
    %c0_i32 = arith.constant 0 : i32
    %0 = arith.cmpi eq, %arg0, %c0_i32 : i32
    %c1_i32 = arith.constant 1 : i32
    %c3_i32 = arith.constant 3 : i32
    %1 = arith.select %0, %c1_i32, %c3_i32 : i32
    %c2_i32 = arith.constant 2 : i32
    %2 = arith.muli %arg0, %c2_i32 : i32
    %3 = arith.addi %2, %arg1 : i32
    %4 = arith.minsi %3, %1 : i32
    %c0_i32_0 = arith.constant 0 : i32
    %c0_i32_1 = arith.constant 0 : i32
    return %4, %c0_i32_0 : i32, i32
  }
  func.func @transform_3(%arg0: i32, %arg1: i32) -> (i32, i32, i32) {
    %c0_i32 = arith.constant 0 : i32
    %c0_i32_0 = arith.constant 0 : i32
    %c0_i32_1 = arith.constant 0 : i32
    return %arg0, %c0_i32, %c0_i32_0 : i32, i32, i32
  }
  func.func @transform_4(%arg0: i32, %arg1: i32) -> (i32, i32, i32) {
    %c0_i32 = arith.constant 0 : i32
    %c0_i32_0 = arith.constant 0 : i32
    %c0_i32_1 = arith.constant 0 : i32
    return %arg0, %c0_i32, %c0_i32_0 : i32, i32, i32
  }
}

</mosaic_0001>

<bundles_post_ra>
// kernel: tpu_custom_call.1
= control target key start
LH: loop header
LB: loop body
LE: loop exit
PB: predicated region body
PF: predicated region fallthrough
CT: control target
= control target key end

     0   :  { %s1326_s0 = inlined_call_operand.hbm [shape: f32[8,40], index: 0, kind: input, shape index: {}]   ;;  %s1327_s1 = inlined_call_operand.hbm [shape: f32[18,40], index: 1, kind: input, shape index: {}]   ;;  %s1328_s2 = inlined_call_operand.hbm [shape: f32[27,40], index: 2, kind: input, shape index: {}]   ;;  %s1329_s3 = inlined_call_operand.vmem [shape: f32[2,1,1], index: 3, kind: output, shape index: {0}]   ;;  %s1330_s4 = inlined_call_operand.vmem [shape: f32[2,1,1], index: 4, kind: output, shape index: {1}]  }
   0x1   :  { %1342 = sst [smem:[#allocation15_spill]] %s1326_s0 }
   0x2   :  { %1343 = sst [smem:[#allocation16_spill]] %s1329_s3 }
   0x3   :  { %1344 = sst [smem:[#allocation17_spill]] %s1330_s4 }
   0x4   :  { %10 = vsyncpa [#allocation5], 0 }
   0x5   :  { %11 = vsyncpa [#allocation7], 0 }
   0x6   :  { %13 = vsyncpa [#allocation7 + $0x1], 0  ;;  %s982_s15 = smov 0   ;;  %s984_s16 = smov 0  }
   0x7   :  { %s986_s17 = smov 0   ;;  %s988_s18 = smov 0  }
   0x8   :  { %s990_s19 = smov 0   ;;  %s992_s20 = smov 0  }
   0x9   :  { %s994_s21 = smov 0   ;;  %s996_s22 = smov 0  }
   0xa   :  { %s998_s23 = smov 0   ;;  %s1000_s24 = smov 0  }
   0xb   :  { %s1002_s25 = smov 0  }
   0xc LB: > { %1345 = sst [smem:[#allocation12_spill]] %s933_s21  ;;  %s28_s26 = sadd.s32 1, %s941_s23  ;;  %s949_s25 = sphi %s1002_s25, %s19_s25   ;;  %s945_s24 = sphi %s1000_s24, %s1386_s24   ;;  %s941_s23 = sphi %s998_s23, %s1378_s23   ;;  %s937_s22 = sphi %s996_s22, %s1385_s22   ;;  %s933_s21 = sphi %s994_s21, %s1377_s21   ;;  %s929_s20 = sphi %s992_s20, %s1384_s20   ;;  %s925_s19 = sphi %s990_s19, %s1383_s19   ;;  %s921_s18 = sphi %s988_s18, %s1382_s18   ;;  %s917_s17 = sphi %s986_s17, %s1381_s17   ;;  %s913_s16 = sphi %s984_s16, %s1380_s16   ;;  %s909_s15 = sphi %s982_s15, %s1379_s15  }
   0xd   : > { %1346 = sst [smem:[#allocation13_spill]] %s941_s23  ;;  %s31_s27 = sadd.s32 1, %s945_s24 }
   0xe   : > { %p29_p0 = scmp.ge.s32.totalorder %s28_s26, 2  ;;  %p56_p1 = scmp.eq.s32.totalorder %s945_s24, 0 }
   0xf   : > { %s611_s28 = sshll.u32 %s945_s24, 1  ;;  %s71_s29 = sadd.s32 1, %s929_s20 }
  0x10   : > { %s1388_s26 = smov (%p29_p0, %s28_s26), 0  ;;  %s1390_s27 = smov (!%p29_p0, %s31_s27), %s945_s24 }
  0x11   : > { %1347 = sst [smem:[#allocation14_spill]] %s1388_s26  ;;  %p33_p2 = scmp.ge.s32.totalorder %s1390_s27, 2 }
  0x12   : > { %s57_s30 = scalar_select %p56_p1, 1, 2 }
  0x13   : > { %s1048_s5 = sadd.s32 %s941_s23, %s611_s28  ;;  %p78_p4 = scmp.ne.s32.totalorder %s929_s20, %s925_s19 }
  0x14   : > { %p60_p3 = scmp.lt.s32.totalorder %s1048_s5, %s57_s30  ;;  %s1392_s27 = smov (%p33_p2, %s1390_s27), 0 }
  0x15   : > { %p1334_p5 = scmp.eq.s32.totalorder %s1392_s27, 0  ;;  %s612_s7 = sshll.u32 %s1392_s27, 1 }
  0x16   : > { %s61_s6 = scalar_select %p60_p3, %s1048_s5, %s57_s30 }
  0x17   : > { %s1059_s8 = sadd.s32 %s612_s7, %s1388_s26  ;;  %p1335_p6 = scmp.eq.s32.totalorder %s949_s25, 0 }
  0x18   : > { %s63_s9 = scalar_select %p1334_p5, 1, 2 }
  0x19   : > { %p1066_p7 = por %p1335_p6, %p78_p4  ;;  %p1333_p9 = scmp.lt.s32.totalorder %s949_s25, 4 }
  0x1a   : > { %p66_p8 = scmp.lt.s32.totalorder %s1059_s8, %s63_s9  ;;  %s209_s11 = sand.u32 1, %s949_s25  }
  0x1b   : > { %s211_s12 = sand.u32 1, %s929_s20   ;;  %s620_s30 = sshll.u32 %s61_s6, 7 }
  0x1c   : > { %s67_s13 = scalar_select %p66_p8, %s1059_s8, %s63_s9 }
  0x1d   : > { %s618_s14 = sshll.u32 %s211_s12, 3  ;;  %s1078_s23 = scalar_lea.hbm %s1327_s1, %s620_s30 }
  0x1e   : > { %s68_s28 = ssub.s32 %s61_s6, %s67_s13  ;;  %s213_s21 = scalar_lea.vmem [#allocation6], %s618_s14 }
  0x1f   : > { %p69_p10 = scmp.eq.s32.totalorder %s68_s28, 0  ;;  %s226_s4 = sshll.u32 %s213_s21, 4  ;;  %s1083_s4 = int_to_ptr.vmem [resolvable:$true] %s226_s4 }
  0x20   : > { %p1089_p11 = pnand %p1333_p9, %p1066_p7  ;;  %s1093_s26 = scalar_lea.sflag [#allocation7], %s209_s11 }
  0x21   : > { %s1081_s3 = scalar_select %p69_p10, %s929_s20, %s71_s29  }
  0x22   : > { %s763_s6 = scalar_lea.hbm %s1078_s23, 128  ;;  %p765_p13 = pneg %p1089_p11 }
  0x23   : > { %p764_p12 = scmp.ne.s32.totalorder %s1078_s23, %s763_s6  ;;  %s768_s10 = scalar_lea.hbm %s1327_s1, 384 }
  0x24   : > { %p769_p3 = scmp.lt.u32.totalorder %s1078_s23, %s1327_s1  ;;  %p770_p4 = scmp.lt.u32.totalorder %s768_s10, %s763_s6 }
  0x25   : > { %p766_p0 = pnand %p765_p13, %p764_p12  ;;  %p772_p8 = scmp.lt.u32.totalorder %s763_s6, %s1078_s23 }
  0x26   : > { %p771_p7 = por %p770_p4, %p769_p3 }
  0x27   : > { %p767_p2 = pneg %p766_p0 }
  0x28   : > { %p773_p10 = por %p772_p8, %p771_p7 }
  0x2a   : > { %p774_p9 = pnand %p773_p10, %p767_p2 }
  0x2c   : > { %777 = shalt.err (!%p774_p9)
}
  0x2d   : > { %s778_s11 = scalar_lea.vmem %s1083_s4, 128  ;;  %s951_s14 = smov [#allocation6]  }
  0x2e   : > { %p779_p12 = scmp.ne.s32.totalorder %s1083_s4, %s778_s11  ;;  %s783_s28 = sshll.u32 %s951_s14, 4  ;;  %s784_s28 = int_to_ptr.vmem [resolvable:$false] %s783_s28 }
  0x2f   : > { %s785_s30 = scalar_lea.vmem %s784_s28, 256  ;;  %p786_p6 = scmp.lt.s32.totalorder %s1083_s4, %s784_s28 }
  0x30   : > { %p781_p0 = pnand %p779_p12, %p765_p13  ;;  %p787_p3 = scmp.lt.s32.totalorder %s785_s30, %s778_s11 }
  0x32   : > { %p782_p5 = pneg %p781_p0  ;;  %p788_p4 = por %p787_p3, %p786_p6 }
  0x34   : > { %p789_p7 = pnand %p788_p4, %p782_p5 }
  0x36   : > { %792 = shalt.err (!%p789_p7)
}
  0x37   : > { %662 = dma.hbm_to_vmem [thread:$0]  (!%p1089_p11), %s1078_s23, 128, %s1083_s4, %s1093_s26  }
  0x38   : > { %s1341_s7 = sadd.s32 4294967295, %s949_s25   ;;  %p84_p5 = scmp.ne.s32.totalorder %s925_s19, %s921_s18 }
  0x39   : > { %p1126_p6 = scmp.eq.s32.totalorder %s1341_s7, 0  ;;  %p122_p9 = scmp.ne.s32.totalorder %s913_s16, %s909_s15 }
  0x3a   : > { %p615_p13 = scmp.ge.s32.totalorder %s949_s25, 1  ;;  %p185_p11 = scmp.lt.s32.totalorder %s949_s25, 5 }
  0x3b   : > { %s1350_s9 = scalar_select %p1126_p6, 1, 0 }
  0x3c   : > { %p1135_p2 = por %p1126_p6, %p84_p5  ;;  %p1142_p8 = por %p122_p9, %p1126_p6 }
  0x3d   : > { %p1146_p10 = pnand %p615_p13, %p185_p11  ;;  %s952_s23 = smov [#allocation4]  }
  0x3e   : > { %s1351_s6 = scalar_select %p1135_p2, 1, 0 }
  0x3f   : > { %s1352_s4 = scalar_select %p1142_p8, 1, 0 }
  0x40   : > { %s1353_s18 = scalar_select %p1146_p10, 1, 0 }
  0x41   : > { %s198_s21 = sshll.u32 %s952_s23, 4  ;;  %p655_p12 = pneg %p1146_p10  ;;  %s199_s21 = int_to_ptr.vmem [resolvable:$true] %s198_s21 }
  0x42   : > { %s95_s29 = scalar_select %p56_p1, 1, 3 }
  0x43   : > { %p1154_p0 = pnand %p655_p12, %p1126_p6  ;;  %s1355_s0 = sld [smem:[#allocation15_spill]] }
  0x45   : > { %p795_p7 = pneg %p1154_p0 }
  0x49   : > { %s793_s13 = scalar_lea.hbm %s1355_s0, 128 }
  0x4a   : > { %p794_p4 = scmp.ne.s32.totalorder %s1355_s0, %s793_s13  ;;  %p800_p13 = scmp.lt.u32.totalorder %s793_s13, %s1355_s0 }
  0x4c   : > { %p796_p5 = pnand %p795_p7, %p794_p4 }
  0x4e   : > { %p797_p9 = pneg %p796_p5 }
  0x50   : > { %p802_p11 = pnand %p800_p13, %p797_p9 }
  0x52   : > { %805 = shalt.err (!%p802_p11)
}
  0x53   : > { %s806_s23 = scalar_lea.vmem %s199_s21, 128  ;;  %p814_p8 = scmp.lt.s32.totalorder %s199_s21, %s199_s21 }
  0x54   : > { %p807_p1 = scmp.ne.s32.totalorder %s199_s21, %s806_s23  ;;  %p815_p2 = scmp.lt.s32.totalorder %s806_s23, %s806_s23 }
  0x56   : > { %p809_p12 = pnand %p807_p1, %p795_p7  ;;  %p816_p6 = por %p815_p2, %p814_p8 }
  0x58   : > { %p810_p3 = pneg %p809_p12 }
  0x5a   : > { %p817_p10 = pnand %p816_p6, %p810_p3 }
  0x5c   : > { %820 = shalt.err (!%p817_p10)
}
  0x5d   : > { %658 = dma.hbm_to_vmem [thread:$0]  (!%p1154_p0), %s1355_s0, 128, %s199_s21, [#allocation5]  }
  0x5e   : > { %p98_p4 = scmp.lt.s32.totalorder %s1048_s5, %s95_s29  ;;  %p1356_p2 = scmp.eq.s32.totalorder %s949_s25, 0 }
  0x5f   : > { %p1357_p6 = scmp.ne.s32.totalorder %s917_s17, %s913_s16  ;;  %p1359_p10 = scmp.eq.s32.totalorder %s1392_s27, 0 }
  0x60   : > { %s1394_s5 = smov (!%p98_p4, %s1048_s5), %s95_s29  ;;  %s235_s11 = sand.u32 1, %s917_s17  }
  0x61   : > { %p1184_p8 = por %p1357_p6, %p1356_p2  ;;  %s621_s14 = sshll.u32 %s235_s11, 3 }
  0x62   : > { %s101_s13 = scalar_select %p1359_p10, 1, 3 }
  0x63   : > { %s623_s28 = sshll.u32 %s1394_s5, 7  ;;  %s109_s30 = sadd.s32 1, %s917_s17 }
  0x64   : > { %p104_p3 = scmp.lt.s32.totalorder %s1059_s8, %s101_s13  ;;  %s237_s23 = scalar_lea.vmem [#allocation8], %s621_s14 }
  0x65   : > { %s250_s10 = sshll.u32 %s237_s23, 4  ;;  %s1198_s0 = scalar_lea.hbm %s1328_s2, %s623_s28  ;;  %s1200_s10 = int_to_ptr.vmem [resolvable:$true] %s250_s10 }
  0x66   : > { %s1396_s8 = smov (!%p104_p3, %s1059_s8), %s101_s13  ;;  %p1360_p7 = scmp.lt.s32.totalorder %s949_s25, 4 }
  0x67   : > { %s106_s21 = ssub.s32 %s1394_s5, %s1396_s8  ;;  %s821_s8 = scalar_lea.hbm %s1198_s0, 128 }
  0x68   : > { %p107_p0 = scmp.eq.s32.totalorder %s106_s21, 0  ;;  %p1206_p5 = pnand %p1360_p7, %p1184_p8 }
  0x69   : > { %p822_p9 = scmp.ne.s32.totalorder %s1198_s0, %s821_s8  ;;  %s826_s15 = scalar_lea.hbm %s1328_s2, 512 }
  0x6a   : > { %s1211_s5 = scalar_select %p107_p0, %s917_s17, %s109_s30  }
  0x6b   : > { %p823_p13 = pneg %p1206_p5  ;;  %p827_p12 = scmp.lt.u32.totalorder %s1198_s0, %s1328_s2 }
  0x6c   : > { %p828_p4 = scmp.lt.u32.totalorder %s826_s15, %s821_s8  ;;  %p830_p6 = scmp.lt.u32.totalorder %s821_s8, %s1198_s0 }
  0x6d   : > { %p824_p11 = pnand %p823_p13, %p822_p9 }
  0x6e   : > { %p829_p2 = por %p828_p4, %p827_p12 }
  0x6f   : > { %p825_p1 = pneg %p824_p11 }
  0x70   : > { %p831_p8 = por %p830_p6, %p829_p2 }
  0x72   : > { %p832_p10 = pnand %p831_p8, %p825_p1 }
  0x74   : > { %835 = shalt.err (!%p832_p10)
}
  0x75   : > { %s836_s28 = scalar_lea.vmem %s1200_s10, 128  ;;  %s953_s30 = smov [#allocation8]  }
  0x76   : > { %p837_p3 = scmp.ne.s32.totalorder %s1200_s10, %s836_s28  ;;  %s841_s21 = sshll.u32 %s953_s30, 4  ;;  %s842_s21 = int_to_ptr.vmem [resolvable:$false] %s841_s21 }
  0x77   : > { %s843_s23 = scalar_lea.vmem %s842_s21, 256  ;;  %p844_p9 = scmp.lt.s32.totalorder %s1200_s10, %s842_s21 }
  0x78   : > { %p839_p0 = pnand %p837_p3, %p823_p13  ;;  %p845_p11 = scmp.lt.s32.totalorder %s843_s23, %s836_s28 }
  0x7a   : > { %p840_p7 = pneg %p839_p0  ;;  %p846_p12 = por %p845_p11, %p844_p9 }
  0x7c   : > { %p847_p4 = pnand %p846_p12, %p840_p7 }
  0x7e   : > { %850 = shalt.err (!%p847_p4)
}
  0x7f   : > { %665 = dma.hbm_to_vmem [thread:$0]  (!%p1206_p5), %s1198_s0, 128, %s1200_s10, %s1093_s26  }
  0x80   : > { %p1362_p1 = scmp.ne.s32.totalorder %s1353_s18, 0 }
  0x81   : > { %p1363_p13 = scmp.ne.s32.totalorder (!%p1362_p1), %s1350_s9, 0 }
  0x82   : > { %259 = sbr.rel (%p1362_p1) target bundleno = 597 (0x255), region = 32 }
  0x89   : > { %896 = dma.done.wait (%p1363_p13), [#allocation5], 128  }
  0x8a   : > { %898 = vsyncadd (%p1363_p13), [#allocation5], 4294967168  ;;  %s1364_s12 = sadd.s32 4294967295, %s949_s25   ;;  %s267_s7 = sand.u32 1, %s925_s19  }
  0x8b   : > { %s265_s8 = sand.u32 1, %s1364_s12   ;;  %s626_s29 = sshll.u32 %s267_s7, 3 }
  0x8c   : > { %s266_s13 = scalar_lea.sflag [#allocation7], %s265_s8  ;;  %s269_s15 = scalar_lea.vmem [#allocation6], %s626_s29 }
  0x8d   : > { %p1365_p2 = scmp.ne.s32.totalorder %s1351_s6, 0 }
  0x8f   : > { %900 = dma.done.wait (%p1365_p2), %s266_s13, 128  }
  0x90   : > { %902 = vsyncadd (%p1365_p2), %s266_s13, 4294967168  ;;  %s276_s0 = sand.u32 1, %s913_s16   ;;  %p1366_p5 = scmp.ne.s32.totalorder %s1352_s4, 0 }
  0x91   : > { %s1253_s26 = sshll.u32 %s276_s0, 3 }
  0x92   : > { %s278_s9 = scalar_lea.vmem [#allocation8], %s1253_s26 }
  0x93   : > { %904 = dma.done.wait (%p1366_p5), %s266_s13, 128  }
  0x94   : > { %906 = vsyncadd (%p1366_p5), %s266_s13, 4294967168  ;;  %p321_p6 = scmp.lt.s32.totalorder %s937_s22, 1  ;;  %s1367_s11 = sld [smem:[#allocation16_spill]] }
  0x95   : > { %s1368_s21 = sld [smem:[#allocation17_spill]]  ;;  %s1369_s12 = sld [smem:[#allocation12_spill]] }
  0x96   : > { %s1262_s18 = scalar_select %p321_p6, %s937_s22, 1 }
  0x9a   : > { %s323_s14 = scalar_lea.vmem %s1367_s11, %s1262_s18 }
  0x9b   : > { %s326_s23 = scalar_lea.vmem %s1368_s21, %s1262_s18  ;;  %p628_p8 = scmp.ne.s32.totalorder %s1369_s12, 0 }
  0x9c   : > { %vm331_vm0 = vcmask (!%p628_p8), 57344   ;;  %vm333_vm1 = vcmask (!%p628_p8), 319488   ;;  %v954_v0 = vmov (!%p628_p8), 0.0  }
  0x9d   : > { %330 = sbr.rel (%p628_p8) target bundleno = 164 (0xa4), region = 48  ;;  %332 = vst.msk [vmem:[#allocation2] sm:$0x1] (!%p628_p8), %vm331_vm0, %v954_v0 }
  0x9e   : > { %334 = vst.msk [vmem:[#allocation3] sm:$0x1] (!%p628_p8), %vm333_vm1, %v954_v0 }
  0xa4 PF: > { %p335_p10 = scmp.eq.s32.totalorder %s937_s22, 0  ;;  %s1370_s8 = sld [smem:[#allocation12_spill]] }
  0xa6   : > { %s336_s4 = scalar_select %p335_p10, 2, 1 }
  0xaa   : > { %p629_p3 = scmp.ge.s32.totalorder %s1370_s8, %s336_s4 }
  0xab   : > { %v342_v1 = vld [vmem:[%s269_s15] sm:$0xff] (!%p629_p3)  ;;  %s1371_s7 = sld [smem:[#allocation12_spill]] (!%p629_p3)  ;;  %vm343_vm2 = vcmask (!%p629_p3), 326656   ;;  %v955_v2 = vmov (!%p629_p3), 0.0   ;;  %vm956_vm3 = vmmov (!%p629_p3), 0   ;;  %v341_v3 = vld [vmem:[#allocation4] sm:$0xff] (!%p629_p3)  ;;  %v423_v4 = vlaneseq (!%p629_p3) }
  0xac   : > { %340 = sbr.rel (%p629_p3) target bundleno = 405 (0x195), region = 52  ;;  %642 = vmatprep.subr.mxu0 (!%p629_p3), %v955_v2  ;;  %644 = vmatprep.mubr.msk.f32.mxu0 (!%p629_p3), %vm956_vm3, %v955_v2  ;;  %s632_s29 = sshll.u32 (!%p629_p3), %s937_s22, 1  ;;  %v428_v12 = vld [vmem:[#allocation2] sm:$0x1] (!%p629_p3)  ;;  %vm433_vm5 = vcmask (!%p629_p3), 57344  }
  0xad   : > { %643 = vmatpush3.xpose.msk.msra.mxu0 (!%p629_p3), %vm343_vm2, %v342_v1  ;;  %v424_v5 = vand.u32 (!%p629_p3), 127, %v423_v4 }
  0xb0   : > { %645 = vmatmul.mubr.msk.f32.vlgmr.msra.gmra.mrb[0].mxu0 (!%p629_p3), %vm343_vm2, %v341_v3 }
  0xb1   : > { %s421_s13 = sadd.s32 (!%p629_p3), %s1371_s7, %s632_s29 }
  0xb2   : > { %s633_s0 = sshll.u32 (!%p629_p3), %s421_s13, 3 }
  0xb3   : > { %v425_v6 = vstv %s633_s0 }
  0xb4   : > { %v426_v7 = vadd.s32 %v425_v6, %v424_v5 }
  0xb6   : > { %vm427_vm4 = vcmp.lt.s32.totalorder %v426_v7, 18 }
 0x183   : > { %v416_v8 = vpop.f32.mrb[0].mxu0 }
 0x184   : > { %v429_v9 = vsel %vm427_vm4, %v416_v8, 1.0  ;;  %v646_v10 = vpop.f32.mrb[1].mxu0 }
 0x185   : > { %761 = vlog2.f32 %v429_v9 }
 0x18f   : > { %v762_v11 = vpop.eup %761 }
 0x190   : > { %v431_v13 = vmul.f32 0.6931472, %v762_v11 }
 0x192   : > { %v432_v14 = vadd.f32 %v431_v13, %v428_v12 }
 0x194   : > { %434 = vst.msk [vmem:[#allocation2] sm:$0x1] %vm433_vm5, %v432_v14 }
 0x195 PF: > { %s1372_s15 = sld [smem:[#allocation12_spill]] }
 0x19b   : > { %p634_p0 = scmp.ge.s32.totalorder %s1372_s15, 2 }
 0x19c   : > { %s1373_s6 = sld [smem:[#allocation12_spill]] (!%p634_p0)  ;;  %s635_s10 = sshll.u32 (!%p634_p0), %s937_s22, 1  ;;  %v442_v15 = vlaneseq (!%p634_p0)  ;;  %v448_v19 = vld [vmem:[%s278_s9] sm:$0xff] (!%p634_p0)  ;;  %vm452_vm6 = vcmask (!%p634_p0), 326656   ;;  %vm461_vm8 = vcmask (!%p634_p0), 319488  }
 0x19d   : > { %438 = sbr.rel (%p634_p0) target bundleno = 441 (0x1b9), region = 56  ;;  %v447_v27 = vld [vmem:[#allocation3] sm:$0x1] (!%p634_p0) }
 0x19e   : > { %v443_v16 = vshrl.u32 (!%p634_p0), %v442_v15, 7 }
 0x1a2   : > { %s440_s11 = sadd.s32 (!%p634_p0), %s1373_s6, %s635_s10 }
 0x1a3   : > { %s636_s28 = sshll.u32 (!%p634_p0), %s440_s11, 3 }
 0x1a4   : > { %v444_v17 = vstv %s636_s28 }
 0x1a5   : > { %v445_v18 = vadd.s32 %v444_v17, %v443_v16 }
 0x1a7   : > { %vm446_vm7 = vcmp.lt.s32.totalorder %v445_v18, 27 }
 0x1a8   : > { %v451_v20 = vsel %vm446_vm7, %v448_v19, 0.0 }
 0x1a9   : > { %v453_v21 = vsel %vm452_vm6, %v451_v20, 0.0 }
 0x1aa   : > { %v454_v22 = vrot.slane %v453_v21, 4 }
 0x1ac   : > { %v455_v23 = vadd.f32 %v454_v22, %v453_v21 }
 0x1ae   : > { %v456_v24 = vrot.slane %v455_v23, 2 }
 0x1b0   : > { %v457_v25 = vadd.f32 %v456_v24, %v455_v23 }
 0x1b2   : > { %v458_v26 = vrot.slane %v457_v25, 1 }
 0x1b4   : > { %v459_v28 = vadd.f32 %v458_v26, %v457_v25 }
 0x1b6   : > { %v460_v29 = vadd.f32 %v459_v28, %v447_v27 }
 0x1b8   : > { %462 = vst.msk [vmem:[#allocation3] sm:$0x1] %vm461_vm8, %v460_v29 }
 0x1b9 PF: > { %s1374_s22 = sld [smem:[#allocation12_spill]] }
 0x1bf   : > { %p637_p7 = scmp.ne.s32.totalorder %s1374_s22, 1 }
 0x1c0   : > { %v467_v30 = vld [vmem:[#allocation2] sm:$0x1] (!%p637_p7)  ;;  %vm468_vm9 = vcmask (!%p637_p7), 57344   ;;  %v474_v31 = vld [vmem:[#allocation3] sm:$0x1] (!%p637_p7)  ;;  %vm477_vm10 = vcmask (!%p637_p7), 319488  }
 0x1c1   : > { %466 = sbr.rel (%p637_p7) target bundleno = 597 (0x255), region = 60  ;;  %v469_v32 = vsel (!%p637_p7), %vm468_vm9, %v467_v30, 0.0  ;;  %v475_v33 = vld [vmem:[#allocation4] sm:$0x1] (!%p637_p7)  ;;  %vm472_vm11 = vcmask (!%p637_p7), 0  }
 0x1c2   : > { %470 = vadd.xlane.f32.xlu0 (!%p637_p7), %v469_v32  ;;  %v476_v34 = vmul.f32 (!%p637_p7), %v475_v33, %v474_v31 }
 0x1c4   : > { %v478_v35 = vsel (!%p637_p7), %vm477_vm10, %v476_v34, 0.0 }
 0x1c6   : > { %479 = vadd.xlane.f32.xlu0 (!%p637_p7), %v478_v35 }
 0x24f   : > { %v471_v36 = vpop.xlane.xlu0 %470 }
 0x250   : > { %473 = vst.msk [vmem:[%s323_s14] sm:$0x1] %vm472_vm11, %v471_v36 }
 0x253   : > { %v480_v37 = vpop.xlane.xlu0 %479 }
 0x254   : > { %481 = vst.msk [vmem:[%s326_s23] sm:$0x1] %vm472_vm11, %v480_v37 }
 0x255 PF: > { %s19_s25 = sadd.s32 1, %s949_s25   ;;  %s1377_s21 = sld [smem:[#allocation13_spill]] }
 0x256   : > { %p16_p9 = scmp.ge.s32.totalorder %s19_s25, 6   ;;  %s1378_s23 = sld [smem:[#allocation14_spill]] }
 0x257   : > { %s1379_s15 = smov %s913_s16  ;;  %s1380_s16 = smov %s917_s17 }
 0x258   : > { %s1381_s17 = smov %s1211_s5  ;;  %s1382_s18 = smov %s925_s19 }
 0x259   : > { %s1383_s19 = smov %s929_s20  ;;  %s1384_s20 = smov %s1081_s3 }
 0x25a   : > { %s1385_s22 = smov %s945_s24  ;;  %s1386_s24 = smov %s1392_s27 }
 0x25b   :  { %18 = sbr.rel (!%p16_p9) target bundleno = 12 (0xc), region = 116 }
 0x262   :  { %511 = vsyncpa [#allocation5], 1 }
 0x263   :  { %513 = vsyncpa [#allocation5 + $0x1], 1 }
 0x264   :  { %514 = vsyncpa [#allocation7], 1 }
 0x265   :  { %516 = vsyncpa [#allocation7 + $0x1], 1 }

</bundles_post_ra>
